<compile_context>
chip_gen: v6e
topology: v6e:2x2x1
jax: 0.10.0
libtpu: 0.0.40
codegen_flags: <defaults>
</compile_context>

<pallas_src>
import numpy as np
import jax
import jax.numpy as jnp
from jax.experimental import pallas as pl
from jax.experimental.pallas import tpu as pltpu

# ---- problem configuration (matches module __init__ args) -------------------
N, C, H, W = 2, 8, 16, 16        # batch, channels (C_in == C_out), spatial
K = 3                            # kernel_size
PAD = 1                          # padding ("same" output at stride 1)
GROUPS = 4                       # GN(4, C)
CPG = C // GROUPS                # channels per group (= 2 here)
EPS = 1e-5                       # nn.GroupNorm default eps
HW = H * W                       # 256
ROWS = N * GROUPS                # 8   (sublane axis)
ROW_LEN = CPG * HW               # 512 (lane axis)
NTAPS = K * K                    # 9

# Static lane shift for each tap t = dy*K + dx  (same convention as jnp.roll:
# rolled[c] = x[c - shift], we want x at pixel offset (dy-1, dx-1)).
SHIFTS = tuple((-((t // K - 1) * W + (t % K - 1))) % ROW_LEN for t in range(NTAPS))


def make_weight_planes(w):
    """Host-side, once per layer (weights are static).

    w: (C, K, K) depthwise filters ->
    planes: (NTAPS, ROWS, ROW_LEN) f32 where
      planes[t, r, c] = weight(channel_of_lane(r, c), tap t) * boundary_valid(t, c)
    so the kernel tap body is just  acc += roll(x, SHIFTS[t]) * planes[t].
    """
    w = np.asarray(w, dtype=np.float32).reshape(C, NTAPS)
    col = np.arange(ROW_LEN)
    p = col % HW                       # pixel index within one channel image
    wcol = p % W                       # image column
    wrow = p // W                      # image row
    chan = col // HW                   # which channel of the group this lane holds
    planes = np.zeros((NTAPS, ROWS, ROW_LEN), dtype=np.float32)
    for r in range(ROWS):
        g = r % GROUPS                 # row r = (sample r // GROUPS, group g)
        for t in range(NTAPS):
            oy, ox = t // K - 1, t % K - 1
            valid = ((wcol + ox >= 0) & (wcol + ox <= W - 1) &
                     (wrow + oy >= 0) & (wrow + oy <= H - 1))
            planes[t, r] = w[g * CPG + chan, t] * valid.astype(np.float32)
    return jnp.asarray(planes)


def _kernel(x_ref, wp_ref, o_ref):
    """Whole batch at once: depthwise 3x3 -> GroupNorm(4) -> ReLU -> + x."""
    x = x_ref[...]                                     # (ROWS, ROW_LEN) f32

    # Depthwise 3x3: 9 taps = static lane roll (XLU) * precomputed masked weight
    # plane (VPU mul-add). No selects, no broadcasts, no mask setup.
    acc = None
    for t in range(NTAPS):
        s = SHIFTS[t]
        src = x if s == 0 else pltpu.roll(x, shift=s, axis=1)
        term = src * wp_ref[t]
        acc = term if acc is None else acc + term

    # GroupNorm(4, C, affine=False): one (sample, group) per row -> pure lane
    # reductions (XLU), biased variance (matches PyTorch), rsqrt on EUP.
    inv_cnt = 1.0 / float(ROW_LEN)
    mean = jnp.sum(acc, axis=1, keepdims=True) * inv_cnt             # (ROWS, 1)
    var = jnp.sum(acc * acc, axis=1, keepdims=True) * inv_cnt - mean * mean
    var = jnp.maximum(var, 0.0)        # single-pass variance can round < 0
    y = (acc - mean) * jax.lax.rsqrt(var + EPS)

    # Act = ReLU, then residual add (Identity branch because stride == 1).
    o_ref[...] = (jnp.maximum(y, 0.0) + x).astype(o_ref.dtype)


@jax.jit
def priv_res_sep_conv(x, w_planes):
    """x: (N, C, H, W) float32, w_planes: (NTAPS, ROWS, ROW_LEN) from make_weight_planes."""
    # Contiguous reshape (layout plumbing only): (N, C, H, W) -> (N*G, CPG*H*W).
    x2 = x.reshape(ROWS, ROW_LEN)
    out = pl.pallas_call(
        _kernel,
        out_shape=jax.ShapeDtypeStruct((ROWS, ROW_LEN), jnp.float32),
        in_specs=[
            pl.BlockSpec(memory_space=pltpu.MemorySpace.VMEM),   # activations
            pl.BlockSpec(memory_space=pltpu.MemorySpace.VMEM),   # weight planes
        ],
        out_specs=pl.BlockSpec(memory_space=pltpu.MemorySpace.VMEM),
        cost_estimate=pl.CostEstimate(
            flops=NTAPS * 2 * ROWS * ROW_LEN + 6 * ROWS * ROW_LEN,
            transcendentals=ROWS,
            bytes_accessed=2 * ROWS * ROW_LEN * 4 + NTAPS * ROWS * ROW_LEN * 4,
        ),
    )(x2, w_planes)
    return out.reshape(N, C, H, W)


def _reference(x, w):
    """Pure-JAX reference mirroring the PyTorch forward."""
    conv = jax.lax.conv_general_dilated(
        x, w.reshape(C, 1, K, K),
        window_strides=(1, 1), padding=((PAD, PAD), (PAD, PAD)),
        dimension_numbers=("NCHW", "OIHW", "NCHW"),
        feature_group_count=C,
        precision=jax.lax.Precision.HIGHEST)
    g = conv.reshape(N, GROUPS, -1)
    mean = jnp.mean(g, axis=-1, keepdims=True)
    var = jnp.mean((g - mean) ** 2, axis=-1, keepdims=True)
    y = ((g - mean) / jnp.sqrt(var + EPS)).reshape(N, C, H, W)
    return jnp.maximum(y, 0.0) + x


if __name__ == "__main__":
    key = jax.random.PRNGKey(0)
    kx, kw = jax.random.split(key)
    x = jax.random.normal(kx, (N, C, H, W), dtype=jnp.float32)
    # Depthwise-conv weights (PyTorch shape (C_out, C_in/groups=1, K, K) -> (C, K, K)).
    w = 0.1 * jax.random.normal(kw, (C, K, K), dtype=jnp.float32)

    # Weight tables are built ONCE per layer (outside the per-call jitted path).
    w_planes = make_weight_planes(w)

    out = jax.block_until_ready(priv_res_sep_conv(x, w_planes))
    ref = jax.block_until_ready(_reference(x, w))
    assert out.shape == (N, C, H, W)
    assert jnp.allclose(out, ref, atol=1e-4, rtol=1e-4), "mismatch vs reference"
    print("KERNEL_OK")
</pallas_src>

<mosaic_0001>
module attributes {stable_mosaic.version = 11 : i64} {
  func.func @_kernel(%arg0: memref<8x512xf32, #tpu.memory_space<vmem>>, %arg1: memref<9x8x512xf32, #tpu.memory_space<vmem>>, %arg2: memref<8x512xf32, #tpu.memory_space<vmem>>) attributes {dimension_semantics = [], scalar_prefetch = 0 : i64, scratch_operands = 0 : i64, tpu.core_type = #tpu.core_type<tc>} {
    %c0 = arith.constant 0 : index
    %c0_0 = arith.constant 0 : index
    %0 = vector.load %arg0[%c0, %c0_0] : memref<8x512xf32, #tpu.memory_space<vmem>>, vector<8x512xf32>
    %c17_i32 = arith.constant 17 : i32
    %1 = tpu.dynamic_rotate %0 by %c17_i32 dim 1 : vector<8x512xf32>, i32 -> vector<8x512xf32>
    %c0_1 = arith.constant 0 : index
    %c0_2 = arith.constant 0 : index
    %c0_3 = arith.constant 0 : index
    %2 = vector.load %arg1[%c0_1, %c0_2, %c0_3] : memref<9x8x512xf32, #tpu.memory_space<vmem>>, vector<1x8x512xf32>
    %3 = vector.shape_cast %2 : vector<1x8x512xf32> to vector<8x512xf32>
    %4 = arith.mulf %1, %3 : vector<8x512xf32>
    %c16_i32 = arith.constant 16 : i32
    %5 = tpu.dynamic_rotate %0 by %c16_i32 dim 1 : vector<8x512xf32>, i32 -> vector<8x512xf32>
    %c1 = arith.constant 1 : index
    %c0_4 = arith.constant 0 : index
    %c0_5 = arith.constant 0 : index
    %6 = vector.load %arg1[%c1, %c0_4, %c0_5] : memref<9x8x512xf32, #tpu.memory_space<vmem>>, vector<1x8x512xf32>
    %7 = vector.shape_cast %6 : vector<1x8x512xf32> to vector<8x512xf32>
    %8 = arith.mulf %5, %7 : vector<8x512xf32>
    %9 = arith.addf %4, %8 : vector<8x512xf32>
    %c15_i32 = arith.constant 15 : i32
    %10 = tpu.dynamic_rotate %0 by %c15_i32 dim 1 : vector<8x512xf32>, i32 -> vector<8x512xf32>
    %c2 = arith.constant 2 : index
    %c0_6 = arith.constant 0 : index
    %c0_7 = arith.constant 0 : index
    %11 = vector.load %arg1[%c2, %c0_6, %c0_7] : memref<9x8x512xf32, #tpu.memory_space<vmem>>, vector<1x8x512xf32>
    %12 = vector.shape_cast %11 : vector<1x8x512xf32> to vector<8x512xf32>
    %13 = arith.mulf %10, %12 : vector<8x512xf32>
    %14 = arith.addf %9, %13 : vector<8x512xf32>
    %c1_i32 = arith.constant 1 : i32
    %15 = tpu.dynamic_rotate %0 by %c1_i32 dim 1 : vector<8x512xf32>, i32 -> vector<8x512xf32>
    %c3 = arith.constant 3 : index
    %c0_8 = arith.constant 0 : index
    %c0_9 = arith.constant 0 : index
    %16 = vector.load %arg1[%c3, %c0_8, %c0_9] : memref<9x8x512xf32, #tpu.memory_space<vmem>>, vector<1x8x512xf32>
    %17 = vector.shape_cast %16 : vector<1x8x512xf32> to vector<8x512xf32>
    %18 = arith.mulf %15, %17 : vector<8x512xf32>
    %19 = arith.addf %14, %18 : vector<8x512xf32>
    %c4 = arith.constant 4 : index
    %c0_10 = arith.constant 0 : index
    %c0_11 = arith.constant 0 : index
    %20 = vector.load %arg1[%c4, %c0_10, %c0_11] : memref<9x8x512xf32, #tpu.memory_space<vmem>>, vector<1x8x512xf32>
    %21 = vector.shape_cast %20 : vector<1x8x512xf32> to vector<8x512xf32>
    %22 = arith.mulf %0, %21 : vector<8x512xf32>
    %23 = arith.addf %19, %22 : vector<8x512xf32>
    %c511_i32 = arith.constant 511 : i32
    %24 = tpu.dynamic_rotate %0 by %c511_i32 dim 1 : vector<8x512xf32>, i32 -> vector<8x512xf32>
    %c5 = arith.constant 5 : index
    %c0_12 = arith.constant 0 : index
    %c0_13 = arith.constant 0 : index
    %25 = vector.load %arg1[%c5, %c0_12, %c0_13] : memref<9x8x512xf32, #tpu.memory_space<vmem>>, vector<1x8x512xf32>
    %26 = vector.shape_cast %25 : vector<1x8x512xf32> to vector<8x512xf32>
    %27 = arith.mulf %24, %26 : vector<8x512xf32>
    %28 = arith.addf %23, %27 : vector<8x512xf32>
    %c497_i32 = arith.constant 497 : i32
    %29 = tpu.dynamic_rotate %0 by %c497_i32 dim 1 : vector<8x512xf32>, i32 -> vector<8x512xf32>
    %c6 = arith.constant 6 : index
    %c0_14 = arith.constant 0 : index
    %c0_15 = arith.constant 0 : index
    %30 = vector.load %arg1[%c6, %c0_14, %c0_15] : memref<9x8x512xf32, #tpu.memory_space<vmem>>, vector<1x8x512xf32>
    %31 = vector.shape_cast %30 : vector<1x8x512xf32> to vector<8x512xf32>
    %32 = arith.mulf %29, %31 : vector<8x512xf32>
    %33 = arith.addf %28, %32 : vector<8x512xf32>
    %c496_i32 = arith.constant 496 : i32
    %34 = tpu.dynamic_rotate %0 by %c496_i32 dim 1 : vector<8x512xf32>, i32 -> vector<8x512xf32>
    %c7 = arith.constant 7 : index
    %c0_16 = arith.constant 0 : index
    %c0_17 = arith.constant 0 : index
    %35 = vector.load %arg1[%c7, %c0_16, %c0_17] : memref<9x8x512xf32, #tpu.memory_space<vmem>>, vector<1x8x512xf32>
    %36 = vector.shape_cast %35 : vector<1x8x512xf32> to vector<8x512xf32>
    %37 = arith.mulf %34, %36 : vector<8x512xf32>
    %38 = arith.addf %33, %37 : vector<8x512xf32>
    %c495_i32 = arith.constant 495 : i32
    %39 = tpu.dynamic_rotate %0 by %c495_i32 dim 1 : vector<8x512xf32>, i32 -> vector<8x512xf32>
    %c8 = arith.constant 8 : index
    %c0_18 = arith.constant 0 : index
    %c0_19 = arith.constant 0 : index
    %40 = vector.load %arg1[%c8, %c0_18, %c0_19] : memref<9x8x512xf32, #tpu.memory_space<vmem>>, vector<1x8x512xf32>
    %41 = vector.shape_cast %40 : vector<1x8x512xf32> to vector<8x512xf32>
    %42 = arith.mulf %39, %41 : vector<8x512xf32>
    %43 = arith.addf %38, %42 : vector<8x512xf32>
    %cst = arith.constant dense<0.000000e+00> : vector<8xf32>
    %44 = vector.multi_reduction <add>, %43, %cst [1] : vector<8x512xf32> to vector<8xf32>
    %45 = vector.shape_cast %44 : vector<8xf32> to vector<8x1xf32>
    %cst_20 = arith.constant 0.001953125 : f32
    %46 = vector.broadcast %cst_20 : f32 to vector<8x1xf32>
    %47 = arith.mulf %45, %46 : vector<8x1xf32>
    %48 = arith.mulf %43, %43 : vector<8x512xf32>
    %cst_21 = arith.constant dense<0.000000e+00> : vector<8xf32>
    %49 = vector.multi_reduction <add>, %48, %cst_21 [1] : vector<8x512xf32> to vector<8xf32>
    %50 = vector.shape_cast %49 : vector<8xf32> to vector<8x1xf32>
    %cst_22 = arith.constant 0.001953125 : f32
    %51 = vector.broadcast %cst_22 : f32 to vector<8x1xf32>
    %52 = arith.mulf %50, %51 : vector<8x1xf32>
    %53 = arith.mulf %47, %47 : vector<8x1xf32>
    %54 = arith.subf %52, %53 : vector<8x1xf32>
    %cst_23 = arith.constant 0.000000e+00 : f32
    %55 = vector.broadcast %cst_23 : f32 to vector<8x1xf32>
    %56 = arith.maximumf %54, %55 : vector<8x1xf32>
    %57 = vector.broadcast %47 : vector<8x1xf32> to vector<8x512xf32>
    %58 = arith.subf %43, %57 : vector<8x512xf32>
    %cst_24 = arith.constant 9.99999974E-6 : f32
    %59 = vector.broadcast %cst_24 : f32 to vector<8x1xf32>
    %60 = arith.addf %56, %59 : vector<8x1xf32>
    %61 = math.rsqrt %60 : vector<8x1xf32>
    %62 = vector.broadcast %61 : vector<8x1xf32> to vector<8x512xf32>
    %63 = arith.mulf %58, %62 : vector<8x512xf32>
    %cst_25 = arith.constant 0.000000e+00 : f32
    %64 = vector.broadcast %cst_25 : f32 to vector<8x512xf32>
    %65 = arith.maximumf %63, %64 : vector<8x512xf32>
    %66 = arith.addf %65, %0 : vector<8x512xf32>
    %c0_26 = arith.constant 0 : index
    %c0_27 = arith.constant 0 : index
    %67 = vector.load %arg2[%c0_26, %c0_27] : memref<8x512xf32, #tpu.memory_space<vmem>>, vector<8x512xf32>
    tpu.vector_store %arg2[%c0_26, %c0_27], %66 {strides = array<i32>} : memref<8x512xf32, #tpu.memory_space<vmem>>, vector<8x512xf32>,
    return
  }
}

</mosaic_0001>

<bundles_post_ra>
// kernel: priv_res_sep_conv.1
= control target key start
LH: loop header
LB: loop body
LE: loop exit
PB: predicated region body
PF: predicated region fallthrough
CT: control target
= control target key end

     0   :  { %s320_s13 = smov 17   ;;  %s321_s16 = smov 16   ;;  %v23_v16 = vlaneseq  ;;  %s617_s0 = inlined_call_operand.vmem [shape: f32[8,512], index: 0, kind: input, shape index: {}]   ;;  %s618_s1 = inlined_call_operand.vmem [shape: f32[9,8,512], index: 1, kind: input, shape index: {}]   ;;  %s619_s2 = inlined_call_operand.vmem [shape: f32[8,512], index: 2, kind: output, shape index: {}]  }
   0x1   :  { %v346_v0 = vld [vmem:[%s617_s0 + $0x18] sm:$0xff]  ;;  %v351_v1 = vld [vmem:[%s617_s0] sm:$0xff]  ;;  %v358_v2 = vld [vmem:[%s617_s0 + $0x8] sm:$0xff]  ;;  %s322_s19 = smov 15   ;;  %s323_s20 = smov 1  }
   0x2   :  { %21 = vrot.lane.b32.xlu1 %v346_v0, %s320_s13  ;;  %15 = vrot.lane.b32.xlu0 %v351_v1, %s320_s13  ;;  %v367_v3 = vld [vmem:[%s617_s0 + $0x10] sm:$0xff]  ;;  %s324_s0 = smov 127   ;;  %s325_s21 = smov 113   ;;  %v395_v19 = vand.u32 127, %v23_v16  ;;  %v30_v24 = vld [vmem:[%s618_s1] sm:$0xff] }
   0x3   :  { %s326_s22 = smov 112   ;;  %s327_s23 = smov 111   ;;  %v278_v26 = vld [vmem:[%s618_s1 + $0x20] sm:$0xff]  ;;  %v31_v28 = vld [vmem:[%s618_s1 + $0x8] sm:$0xff]  ;;  %v280_v32 = vld [vmem:[%s618_s1 + $0x30] sm:$0xff] }
   0x4   :  { %vm25_vm0 = vcmp.lt.s32.totalorder %v395_v19, 17  ;;  %vm46_vm1 = vcmp.lt.s32.totalorder %v395_v19, 16  ;;  %v279_v30 = vld [vmem:[%s618_s1 + $0x28] sm:$0xff]  ;;  %vm72_vm2 = vcmp.lt.s32.totalorder %v395_v19, 15  ;;  %v281_v35 = vld [vmem:[%s618_s1 + $0x38] sm:$0xff]  ;;  %v32_v38 = vld [vmem:[%s618_s1 + $0x10] sm:$0xff] }
   0x5   :  { %v282_v40 = vld [vmem:[%s618_s1 + $0x40] sm:$0xff]  ;;  %v33_v44 = vld [vmem:[%s618_s1 + $0x18] sm:$0xff]  ;;  %vm98_vm3 = vcmp.lt.s32.totalorder %v395_v19, 1  ;;  %v283_v48 = vld [vmem:[%s618_s1 + $0x48] sm:$0xff]  ;;  %vm137_vm4 = vcmp.lt.s32.totalorder %v395_v19, 127  ;;  %vm163_vm5 = vcmp.lt.s32.totalorder %v395_v19, 113 }
   0x6   :  { %38 = vrot.lane.b32.xlu1 %v351_v1, %s321_s16  ;;  %17 = vrot.lane.b32.xlu0 %v358_v2, %s320_s13  ;;  %v286_v50 = vld [vmem:[%s618_s1 + $0x60] sm:$0xff]  ;;  %v284_v59 = vld [vmem:[%s618_s1 + $0x50] sm:$0xff]  ;;  %vm189_vm6 = vcmp.lt.s32.totalorder %v395_v19, 112  ;;  %vm215_vm7 = vcmp.lt.s32.totalorder %v395_v19, 111 }
   0x7   :  { %v285_v61 = vld [vmem:[%s618_s1 + $0x58] sm:$0xff]  ;;  %v287_v63 = vld [vmem:[%s618_s1 + $0x68] sm:$0xff] }
   0xa   :  { %44 = vrot.lane.b32.xlu1 %v346_v0, %s321_s16  ;;  %40 = vrot.lane.b32.xlu0 %v358_v2, %s321_s16 }
   0xe   :  { %42 = vrot.lane.b32.xlu1 %v367_v3, %s321_s16  ;;  %19 = vrot.lane.b32.xlu0 %v367_v3, %s320_s13 }
  0x12   :  { %66 = vrot.lane.b32.xlu1 %v358_v2, %s322_s19  ;;  %64 = vrot.lane.b32.xlu0 %v351_v1, %s322_s19 }
  0x16   :  { %68 = vrot.lane.b32.xlu1 %v367_v3, %s322_s19  ;;  %70 = vrot.lane.b32.xlu0 %v346_v0, %s322_s19 }
  0x1a   :  { %92 = vrot.lane.b32.xlu1 %v358_v2, %s323_s20  ;;  %90 = vrot.lane.b32.xlu0 %v351_v1, %s323_s20 }
  0x1e   :  { %94 = vrot.lane.b32.xlu1 %v367_v3, %s323_s20  ;;  %96 = vrot.lane.b32.xlu0 %v346_v0, %s323_s20 }
  0x22   :  { %131 = vrot.lane.b32.xlu1 %v358_v2, %s324_s0  ;;  %129 = vrot.lane.b32.xlu0 %v351_v1, %s324_s0 }
  0x26   :  { %135 = vrot.lane.b32.xlu1 %v346_v0, %s324_s0  ;;  %133 = vrot.lane.b32.xlu0 %v367_v3, %s324_s0 }
  0x2a   :  { %157 = vrot.lane.b32.xlu1 %v358_v2, %s325_s21  ;;  %155 = vrot.lane.b32.xlu0 %v351_v1, %s325_s21 }
  0x2e   :  { %161 = vrot.lane.b32.xlu1 %v346_v0, %s325_s21  ;;  %159 = vrot.lane.b32.xlu0 %v367_v3, %s325_s21 }
  0x32   :  { %183 = vrot.lane.b32.xlu1 %v358_v2, %s326_s22  ;;  %181 = vrot.lane.b32.xlu0 %v351_v1, %s326_s22 }
  0x36   :  { %187 = vrot.lane.b32.xlu1 %v346_v0, %s326_s22  ;;  %185 = vrot.lane.b32.xlu0 %v367_v3, %s326_s22 }
  0x3a   :  { %209 = vrot.lane.b32.xlu1 %v358_v2, %s327_s23  ;;  %207 = vrot.lane.b32.xlu0 %v351_v1, %s327_s23 }
  0x3e   :  { %213 = vrot.lane.b32.xlu1 %v346_v0, %s327_s23  ;;  %211 = vrot.lane.b32.xlu0 %v367_v3, %s327_s23 }
  0x74   :  { %v22_v4 = vpop.permute.xlu1 %21  ;;  %v16_v5 = vpop.permute.xlu0 %15 }
  0x75   :  { %v29_v25 = vsel %vm25_vm0, %v22_v4, %v16_v5 }
  0x76   :  { %v34_v42 = vmul.f32 %v30_v24, %v29_v25  ;;  %v291_v24 = vld [vmem:[%s618_s1 + $0x88] sm:$0xff] }
  0x78   :  { %v39_v6 = vpop.permute.xlu1 %38  ;;  %v18_v7 = vpop.permute.xlu0 %17 }
  0x79   :  { %v28_v29 = vsel %vm25_vm0, %v16_v5, %v18_v7 }
  0x7a   :  { %v35_v46 = vmul.f32 %v31_v28, %v28_v29 }
  0x7c   :  { %v45_v8 = vpop.permute.xlu1 %44  ;;  %v41_v9 = vpop.permute.xlu0 %40 }
  0x7d   :  { %v50_v27 = vsel %vm46_vm1, %v45_v8, %v39_v6  ;;  %v49_v31 = vsel %vm46_vm1, %v39_v6, %v41_v9 }
  0x7e   :  { %v56_v43 = vmul.f32 %v278_v26, %v50_v27  ;;  %v57_v47 = vmul.f32 %v279_v30, %v49_v31 }
  0x80   :  { %v43_v10 = vpop.permute.xlu1 %42  ;;  %v20_v11 = vpop.permute.xlu0 %19  ;;  %v60_v5 = vadd.f32 %v56_v43, %v34_v42 }
  0x81   :  { %v47_v36 = vsel %vm46_vm1, %v43_v10, %v45_v8  ;;  %v48_v37 = vsel %vm46_vm1, %v41_v9, %v43_v10  ;;  %v27_v39 = vsel %vm25_vm0, %v18_v7, %v20_v11  ;;  %v26_v45 = vsel %vm25_vm0, %v20_v11, %v22_v4  ;;  %v290_v8 = vld [vmem:[%s618_s1 + $0x80] sm:$0xff]  ;;  %v288_v10 = vld [vmem:[%s618_s1 + $0x70] sm:$0xff] }
  0x82   :  { %v58_v52 = vmul.f32 %v280_v32, %v48_v37  ;;  %v59_v53 = vmul.f32 %v281_v35, %v47_v36  ;;  %v36_v54 = vmul.f32 %v32_v38, %v27_v39  ;;  %v37_v58 = vmul.f32 %v33_v44, %v26_v45  ;;  %v292_v32 = vld [vmem:[%s618_s1 + $0x90] sm:$0xff]  ;;  %v294_v39 = vld [vmem:[%s618_s1 + $0xa0] sm:$0xff]  ;;  %v295_v45 = vld [vmem:[%s618_s1 + $0xa8] sm:$0xff] }
  0x83   :  { %v61_v9 = vadd.f32 %v57_v47, %v35_v46  ;;  %v122_v35 = vmul.f32 %v291_v24, %v358_v2  ;;  %v123_v44 = vmul.f32 %v292_v32, %v367_v3 }
  0x84   :  { %v67_v12 = vpop.permute.xlu1 %66  ;;  %v65_v13 = vpop.permute.xlu0 %64  ;;  %v62_v27 = vadd.f32 %v58_v52, %v36_v54  ;;  %v63_v28 = vadd.f32 %v59_v53, %v37_v58  ;;  %v297_v53 = vld [vmem:[%s618_s1 + $0xb8] sm:$0xff]  ;;  %v298_v54 = vld [vmem:[%s618_s1 + $0xc0] sm:$0xff] }
  0x85   :  { %v75_v49 = vsel %vm72_vm2, %v65_v13, %v67_v12 }
  0x86   :  { %v83_v6 = vmul.f32 %v283_v48, %v75_v49 }
  0x88   :  { %v69_v14 = vpop.permute.xlu1 %68  ;;  %v71_v15 = vpop.permute.xlu0 %70  ;;  %v87_v29 = vadd.f32 %v83_v6, %v61_v9 }
  0x89   :  { %v76_v41 = vsel %vm72_vm2, %v71_v15, %v65_v13  ;;  %v74_v60 = vsel %vm72_vm2, %v67_v12, %v69_v14  ;;  %v73_v62 = vsel %vm72_vm2, %v69_v14, %v71_v15  ;;  %v289_v12 = vld [vmem:[%s618_s1 + $0x78] sm:$0xff] }
  0x8a   :  { %v82_v55 = vmul.f32 %v282_v40, %v76_v41  ;;  %v84_v14 = vmul.f32 %v284_v59, %v74_v60  ;;  %v85_v15 = vmul.f32 %v285_v61, %v73_v62 }
  0x8c   :  { %v93_v17 = vpop.permute.xlu1 %92  ;;  %v91_v18 = vpop.permute.xlu0 %90  ;;  %v86_v16 = vadd.f32 %v82_v55, %v60_v5  ;;  %v88_v36 = vadd.f32 %v84_v14, %v62_v27  ;;  %v89_v37 = vadd.f32 %v85_v15, %v63_v28  ;;  %v302_v5 = vld [vmem:[%s618_s1 + $0xe0] sm:$0xff] }
  0x8d   :  { %v101_v4 = vsel %vm98_vm3, %v91_v18, %v93_v17 }
  0x90   :  { %v95_v20 = vpop.permute.xlu1 %94  ;;  %v97_v21 = vpop.permute.xlu0 %96 }
  0x91   :  { %v102_v51 = vsel %vm98_vm3, %v97_v21, %v91_v18  ;;  %v100_v11 = vsel %vm98_vm3, %v93_v17, %v95_v20  ;;  %v99_v13 = vsel %vm98_vm3, %v95_v20, %v97_v21  ;;  %v109_v18 = vmul.f32 %v287_v63, %v101_v4  ;;  %v293_v21 = vld [vmem:[%s618_s1 + $0x98] sm:$0xff] }
  0x92   :  { %v108_v7 = vmul.f32 %v286_v50, %v102_v51  ;;  %v121_v17 = vmul.f32 %v290_v8, %v351_v1  ;;  %v110_v30 = vmul.f32 %v288_v10, %v100_v11  ;;  %v111_v31 = vmul.f32 %v289_v12, %v99_v13  ;;  %v296_v50 = vld [vmem:[%s618_s1 + $0xb0] sm:$0xff]  ;;  %v301_v4 = vld [vmem:[%s618_s1 + $0xd8] sm:$0xff] }
  0x93   :  { %v113_v38 = vadd.f32 %v109_v18, %v87_v29  ;;  %v124_v43 = vmul.f32 %v293_v21, %v346_v0  ;;  %v306_v18 = vld [vmem:[%s618_s1 + $0x100] sm:$0xff] }
  0x94   :  { %v399_v22 = vpop.permute.xlu1 %131  ;;  %v401_v23 = vpop.permute.xlu0 %129  ;;  %v112_v20 = vadd.f32 %v108_v7, %v86_v16  ;;  %v114_v47 = vadd.f32 %v110_v30, %v88_v36  ;;  %v115_v48 = vadd.f32 %v111_v31, %v89_v37  ;;  %v303_v7 = vld [vmem:[%s618_s1 + $0xe8] sm:$0xff]  ;;  %v305_v30 = vld [vmem:[%s618_s1 + $0xf8] sm:$0xff] }
  0x95   :  { %v140_v40 = vsel %vm137_vm4, %v401_v23, %v399_v22  ;;  %v126_v59 = vadd.f32 %v122_v35, %v113_v38 }
  0x96   :  { %v125_v49 = vadd.f32 %v121_v17, %v112_v20  ;;  %v147_v52 = vmul.f32 %v294_v39, %v140_v40  ;;  %v128_v14 = vadd.f32 %v124_v43, %v115_v48  ;;  %v127_v15 = vadd.f32 %v123_v44, %v114_v47  ;;  %v309_v39 = vld [vmem:[%s618_s1 + $0x118] sm:$0xff]  ;;  %v307_v40 = vld [vmem:[%s618_s1 + $0x108] sm:$0xff] }
  0x98   :  { %v427_v33 = vpop.permute.xlu1 %135  ;;  %v429_v34 = vpop.permute.xlu0 %133  ;;  %v151_v13 = vadd.f32 %v147_v52, %v125_v49 }
  0x99   :  { %v139_v46 = vsel %vm137_vm4, %v399_v22, %v429_v34  ;;  %v138_v51 = vsel %vm137_vm4, %v429_v34, %v427_v33  ;;  %v141_v22 = vsel %vm137_vm4, %v427_v33, %v401_v23  ;;  %v299_v34 = vld [vmem:[%s618_s1 + $0xc8] sm:$0xff]  ;;  %v300_v23 = vld [vmem:[%s618_s1 + $0xd0] sm:$0xff] }
  0x9a   :  { %v148_v60 = vmul.f32 %v295_v45, %v139_v46  ;;  %v149_v63 = vmul.f32 %v296_v50, %v138_v51  ;;  %v150_v9 = vmul.f32 %v297_v53, %v141_v22 }
  0x9c   :  { %v158_v56 = vpop.permute.xlu1 %157  ;;  %v464_v57 = vpop.permute.xlu0 %155  ;;  %v152_v24 = vadd.f32 %v148_v60, %v126_v59  ;;  %v153_v29 = vadd.f32 %v149_v63, %v127_v15  ;;  %v154_v32 = vadd.f32 %v150_v9, %v128_v14 }
  0x9d   :  { %v166_v55 = vsel %vm163_vm5, %v464_v57, %v158_v56 }
  0x9e   :  { %v173_v10 = vmul.f32 %v298_v54, %v166_v55 }
  0xa0   :  { %v162_v25 = vpop.permute.xlu1 %161  ;;  %v160_v26 = vpop.permute.xlu0 %159  ;;  %v177_v35 = vadd.f32 %v173_v10, %v151_v13 }
  0xa1   :  { %v165_v58 = vsel %vm163_vm5, %v158_v56, %v160_v26  ;;  %v164_v33 = vsel %vm163_vm5, %v160_v26, %v162_v25  ;;  %v167_v56 = vsel %vm163_vm5, %v162_v25, %v464_v57  ;;  %v304_v57 = vld [vmem:[%s618_s1 + $0xf0] sm:$0xff] }
  0xa2   :  { %v174_v11 = vmul.f32 %v299_v34, %v165_v58  ;;  %v175_v16 = vmul.f32 %v300_v23, %v164_v33  ;;  %v176_v25 = vmul.f32 %v301_v4, %v167_v56 }
  0xa4   :  { %v184_v41 = vpop.permute.xlu1 %183  ;;  %v182_v42 = vpop.permute.xlu0 %181  ;;  %v178_v36 = vadd.f32 %v174_v11, %v152_v24  ;;  %v179_v38 = vadd.f32 %v175_v16, %v153_v29 }
  0xa5   :  { %v192_v6 = vsel %vm189_vm6, %v182_v42, %v184_v41 }
  0xa6   :  { %v199_v26 = vmul.f32 %v302_v5, %v192_v6 }
  0xa8   :  { %v188_v61 = vpop.permute.xlu1 %187  ;;  %v186_v62 = vpop.permute.xlu0 %185  ;;  %v203_v43 = vadd.f32 %v199_v26, %v177_v35 }
  0xa9   :  { %v191_v8 = vsel %vm189_vm6, %v184_v41, %v186_v62  ;;  %v190_v12 = vsel %vm189_vm6, %v186_v62, %v188_v61  ;;  %v193_v31 = vsel %vm189_vm6, %v188_v61, %v182_v42  ;;  %v308_v41 = vld [vmem:[%s618_s1 + $0x110] sm:$0xff]  ;;  %v180_v42 = vadd.f32 %v176_v25, %v154_v32 }
  0xaa   :  { %v200_v27 = vmul.f32 %v303_v7, %v191_v8  ;;  %v201_v20 = vmul.f32 %v304_v57, %v190_v12  ;;  %v202_v44 = vmul.f32 %v305_v30, %v193_v31 }
  0xac   :  { %v210_v28 = vpop.permute.xlu1 %209  ;;  %v208_v17 = vpop.permute.xlu0 %207  ;;  %v204_v45 = vadd.f32 %v200_v27, %v178_v36  ;;  %v205_v48 = vadd.f32 %v201_v20, %v179_v38  ;;  %v206_v55 = vadd.f32 %v202_v44, %v180_v42 }
  0xad   :  { %v218_v21 = vsel %vm215_vm7, %v208_v17, %v210_v28 }
  0xae   :  { %v225_v37 = vmul.f32 %v306_v18, %v218_v21 }
  0xb0   :  { %v214_v46 = vpop.permute.xlu1 %213  ;;  %v212_v47 = vpop.permute.xlu0 %211  ;;  %v229_v52 = vadd.f32 %v225_v37, %v203_v43 }
  0xb1   :  { %v219_v49 = vsel %vm215_vm7, %v214_v46, %v208_v17  ;;  %v216_v50 = vsel %vm215_vm7, %v212_v47, %v214_v46  ;;  %v217_v51 = vsel %vm215_vm7, %v210_v28, %v212_v47 }
  0xb2   :  { %v228_v53 = vmul.f32 %v309_v39, %v219_v49  ;;  %v226_v22 = vmul.f32 %v307_v40, %v217_v51  ;;  %v227_v54 = vmul.f32 %v308_v41, %v216_v50  ;;  %v239_v23 = vmul.f32 %v229_v52, %v229_v52 }
  0xb4   :  { %v230_v34 = vadd.f32 %v226_v22, %v204_v45  ;;  %v231_v58 = vadd.f32 %v227_v54, %v205_v48  ;;  %v232_v59 = vadd.f32 %v228_v53, %v206_v55 }
  0xb6   :  { %v233_v60 = vadd.f32 %v230_v34, %v229_v52  ;;  %v240_v33 = vmul.f32 %v230_v34, %v230_v34  ;;  %v241_v62 = vmul.f32 %v231_v58, %v231_v58  ;;  %v242_v56 = vmul.f32 %v232_v59, %v232_v59 }
  0xb8   :  { %v234_v61 = vadd.f32 %v233_v60, %v231_v58  ;;  %v243_v63 = vadd.f32 %v240_v33, %v239_v23 }
  0xba   :  { %v235_v4 = vadd.f32 %v234_v61, %v232_v59  ;;  %v244_v5 = vadd.f32 %v243_v63, %v241_v62 }
  0xbc   :  { %236 = vadd.xlane.f32.xlu0 %v235_v4  ;;  %v245_v19 = vadd.f32 %v244_v5, %v242_v56 }
  0xbe   :  { %246 = vadd.xlane.f32.xlu1 %v245_v19 }
 0x145   :  { %v237_v6 = vpop.xlane.xlu0 %236 }
 0x146   :  { %v238_v7 = vmul.f32 0.001953125, %v237_v6 }
 0x147   :  { %v247_v8 = vpop.xlane.xlu1 %246 }
 0x148   :  { %v248_v9 = vmul.f32 0.001953125, %v247_v8  ;;  %v249_v10 = vmul.f32 %v238_v7, %v238_v7  ;;  %v252_v13 = vsub.f32 %v229_v52, %v238_v7  ;;  %v253_v14 = vsub.f32 %v230_v34, %v238_v7 }
 0x149   :  { %v254_v15 = vsub.f32 %v231_v58, %v238_v7  ;;  %v255_v16 = vsub.f32 %v232_v59, %v238_v7 }
 0x14a   :  { %v250_v11 = vsub.f32 %v248_v9, %v249_v10 }
 0x14c   :  { %v251_v57 = vmax.f32 %v250_v11, 0.0 }
 0x14e   :  { %v256_v12 = vadd.f32 1e-05, %v251_v57 }
 0x150   :  { %318 = vrsqrt.f32 %v256_v12 }
 0x15d   :  { %v319_v18 = vpop.eup %318 }
 0x15e   :  { %v258_v24 = vmul.f32 %v319_v18, %v252_v13  ;;  %v259_v25 = vmul.f32 %v319_v18, %v253_v14  ;;  %v260_v26 = vmul.f32 %v319_v18, %v254_v15  ;;  %v261_v27 = vmul.f32 %v319_v18, %v255_v16 }
 0x160   :  { %v262_v28 = vmax.f32 %v258_v24, 0.0  ;;  %v263_v17 = vmax.f32 %v259_v25, 0.0  ;;  %v264_v29 = vmax.f32 %v260_v26, 0.0  ;;  %v265_v30 = vmax.f32 %v261_v27, 0.0 }
 0x162   :  { %v266_v31 = vadd.f32 %v262_v28, %v351_v1  ;;  %v267_v20 = vadd.f32 %v263_v17, %v358_v2  ;;  %v268_v21 = vadd.f32 %v264_v29, %v367_v3  ;;  %v269_v32 = vadd.f32 %v265_v30, %v346_v0 }
 0x164   :  { %270 = vst [vmem:[%s619_s2] sm:$0xff] %v266_v31  ;;  %271 = vst [vmem:[%s619_s2 + $0x8] sm:$0xff] %v267_v20 }
 0x165   :  { %272 = vst [vmem:[%s619_s2 + $0x10] sm:$0xff] %v268_v21  ;;  %273 = vst [vmem:[%s619_s2 + $0x18] sm:$0xff] %v269_v32 }

</bundles_post_ra>
